<compile_context>
chip_gen: v6e
topology: v6e:2x2x1
jax: 0.10.0
libtpu: 0.0.40
codegen_flags: <defaults>
</compile_context>

<pallas_src>
import functools

import jax
import jax.numpy as jnp
from jax.experimental import pallas as pl
from jax.experimental.pallas import tpu as pltpu

CLIP_EPS = 0.2
MASK_EPS = 1e-8
_LANES = 128


def _round_up(x, m):
    return ((x + m - 1) // m) * m


def _vmem_budget_and_limit():
    """Generation-aware VMEM budgets: ~32 MiB tile budget on v7x (64 MiB
    physical VMEM), ~64 MiB on v5e/v6e (128 MiB physical)."""
    try:
        cap = int(pltpu.get_tpu_info().vmem_capacity_bytes)
    except Exception:
        cap = 64 * 1024 * 1024                 # v7x-safe fallback
    budget = min(cap // 2, 64 * 1024 * 1024)
    limit = min((cap * 3) // 4, 96 * 1024 * 1024)
    limit = max(limit, budget + (8 << 20))
    return budget, int(limit)


def _padded_rows(rows, itemsize):
    # VMEM tiles pad the sublane dim to 32 bytes worth of rows per dtype
    # (8 rows f32, 16 rows bf16, 32 rows int8).
    sub = max(8, 32 // max(1, itemsize))
    return _round_up(rows, sub)


def _choose_seq_tile(bt, seq, in_itemsize, mask_itemsize, budget):
    """Largest lane-dense sequence tile whose double-buffered input working
    set fits `budget` bytes.  No artificial column cap: per-step overhead is
    ~0.35 us regardless of block size, so bigger blocks win."""
    per_col = 2 * 3 * _padded_rows(bt, in_itemsize) * in_itemsize
    if mask_itemsize:
        per_col += 2 * _padded_rows(bt, mask_itemsize) * mask_itemsize
    max_cols = max(_LANES, (budget // per_col) // _LANES * _LANES)
    return int(min(max_cols, _round_up(seq, _LANES)))


def _surrogate_loss(delta, adv, clip_eps):
    ratio = jnp.exp(delta)
    surr1 = ratio * adv
    surr2 = jnp.clip(ratio, 1.0 - clip_eps, 1.0 + clip_eps) * adv
    return -jnp.minimum(surr1, surr2)


def _tail_valid(shape, si, seq_tile, seq_len):
    col = jax.lax.broadcasted_iota(jnp.int32, shape, 1)
    return (col + si * seq_tile) < seq_len


def _masked_kernel(lp_ref, olp_ref, adv_ref, mask_ref, out_ref,
                   num_acc, den_acc, *, clip_eps, seq_len, seq_tile, ragged):
    si = pl.program_id(1)

    @pl.when(si == 0)
    def _init():
        num_acc[...] = jnp.zeros_like(num_acc)
        den_acc[...] = jnp.zeros_like(den_acc)

    delta = lp_ref[...].astype(jnp.float32) - olp_ref[...].astype(jnp.float32)
    adv = adv_ref[...].astype(jnp.float32)
    m = mask_ref[...].astype(jnp.float32)

    if ragged:
        # Out-of-bounds lanes of the last block hold unspecified data; zero
        # them before exp so no inf/NaN can leak into the accumulators.
        valid = _tail_valid(delta.shape, si, seq_tile, seq_len)
        delta = jnp.where(valid, delta, 0.0)
        adv = jnp.where(valid, adv, 0.0)
        m = jnp.where(valid, m, 0.0)

    loss = _surrogate_loss(delta, adv, clip_eps)

    # Per-step lane reductions into tiny (bt, 1) accumulators: no full-width
    # accumulator read-modify-write on the hot path.
    num_acc[...] += jnp.sum(loss * m, axis=1, keepdims=True)
    den_acc[...] += jnp.sum(m, axis=1, keepdims=True)

    @pl.when(si == pl.num_programs(1) - 1)
    def _finalize():
        out_ref[...] = num_acc[...] / (den_acc[...] + MASK_EPS)


def _unmasked_kernel(lp_ref, olp_ref, adv_ref, out_ref, acc_ref,
                     *, clip_eps, seq_len, seq_tile, ragged):
    si = pl.program_id(1)

    @pl.when(si == 0)
    def _init():
        acc_ref[...] = jnp.zeros_like(acc_ref)

    delta = lp_ref[...].astype(jnp.float32) - olp_ref[...].astype(jnp.float32)
    adv = adv_ref[...].astype(jnp.float32)

    if ragged:
        valid = _tail_valid(delta.shape, si, seq_tile, seq_len)
        delta = jnp.where(valid, delta, 0.0)
        adv = jnp.where(valid, adv, 0.0)

    loss = _surrogate_loss(delta, adv, clip_eps)
    acc_ref[...] += jnp.sum(loss, axis=1, keepdims=True)

    @pl.when(si == pl.num_programs(1) - 1)
    def _finalize():
        out_ref[...] = acc_ref[...] / float(seq_len)


def policy_loss(log_probs, old_log_probs, advantages, action_mask=None,
                clip_eps=CLIP_EPS, seq_tile=None):
    """Pallas TPU implementation of PolicyLoss.forward. Returns a scalar.

    Preferred calling convention (mem-bound kernel): bf16 log_probs /
    old_log_probs / advantages and a bool or int8 action_mask; the kernel
    upcasts to f32 internally.
    """
    B, S = log_probs.shape

    mask = None
    if action_mask is not None:
        if action_mask.dtype == jnp.bool_:
            mask = action_mask.astype(jnp.int8)        # 1 byte/elem stream
        elif jnp.issubdtype(action_mask.dtype, jnp.floating):
            mask = action_mask                          # exact weighted mean
        else:
            mask = action_mask.astype(jnp.int32)        # avoid int8 wraparound

    in_itemsize = max(jnp.dtype(log_probs.dtype).itemsize,
                      jnp.dtype(advantages.dtype).itemsize)
    mask_itemsize = 0 if mask is None else jnp.dtype(mask.dtype).itemsize

    # One "parallel" batch shard per v7x TensorCore when the batch is large
    # enough to keep block rows a multiple of 8; harmless on 1-TC parts.
    n_btiles = 2 if (B >= 16 and B % 16 == 0) else 1
    bt = B // n_btiles

    budget, vmem_limit = _vmem_budget_and_limit()
    if seq_tile is None:
        seq_tile = _choose_seq_tile(bt, S, in_itemsize, mask_itemsize, budget)
    assert seq_tile % _LANES == 0

    n_stiles = pl.cdiv(S, seq_tile)
    ragged = (S % seq_tile) != 0     # handled in-kernel, no jnp.pad copies

    io_spec = pl.BlockSpec((bt, seq_tile), lambda bi, si: (bi, si))
    out_spec = pl.BlockSpec((bt, 1), lambda bi, si: (bi, 0))
    out_shape = jax.ShapeDtypeStruct((B, 1), jnp.float32)

    compiler_params = pltpu.CompilerParams(
        dimension_semantics=("parallel", "arbitrary"),
        vmem_limit_bytes=vmem_limit,
    )
    n_elem = B * S
    cost = pl.CostEstimate(
        flops=8 * n_elem,
        transcendentals=n_elem,
        bytes_accessed=int(n_elem * (3 * in_itemsize + mask_itemsize) + B * 4),
    )

    common = dict(clip_eps=clip_eps, seq_len=S, seq_tile=seq_tile,
                  ragged=ragged)

    if mask is not None:
        per_row = pl.pallas_call(
            functools.partial(_masked_kernel, **common),
            grid=(n_btiles, n_stiles),
            in_specs=[io_spec, io_spec, io_spec, io_spec],
            out_specs=out_spec,
            out_shape=out_shape,
            scratch_shapes=[pltpu.VMEM((bt, 1), jnp.float32),
                            pltpu.VMEM((bt, 1), jnp.float32)],
            compiler_params=compiler_params,
            cost_estimate=cost,
        )(log_probs, old_log_probs, advantages, mask)
    else:
        per_row = pl.pallas_call(
            functools.partial(_unmasked_kernel, **common),
            grid=(n_btiles, n_stiles),
            in_specs=[io_spec, io_spec, io_spec],
            out_specs=out_spec,
            out_shape=out_shape,
            scratch_shapes=[pltpu.VMEM((bt, 1), jnp.float32)],
            compiler_params=compiler_params,
            cost_estimate=cost,
        )(log_probs, old_log_probs, advantages)

    # Tiny JAX epilogue: mean over the batch of per-row losses.
    return jnp.mean(per_row)


def _reference_policy_loss(log_probs, old_log_probs, advantages,
                           action_mask=None, clip_eps=CLIP_EPS):
    lp = log_probs.astype(jnp.float32)
    olp = old_log_probs.astype(jnp.float32)
    adv = advantages.astype(jnp.float32)
    ratio = jnp.exp(lp - olp)
    surr1 = ratio * adv
    surr2 = jnp.clip(ratio, 1.0 - clip_eps, 1.0 + clip_eps) * adv
    loss = -jnp.minimum(surr1, surr2)
    if action_mask is not None:
        m = action_mask.astype(loss.dtype)
        loss = (loss * m).sum(axis=1) / (m.sum(axis=1) + MASK_EPS)
    return loss.mean()


if __name__ == "__main__":
    key = jax.random.PRNGKey(0)
    k1, k2, k3, k4 = jax.random.split(key, 4)

    # Small shapes consistent with the module: batch=2, 8 action tokens.
    B, S = 2, 8
    log_probs = jax.random.normal(k1, (B, S), dtype=jnp.float32) * 0.1 - 2.0
    old_log_probs = jax.random.normal(k2, (B, S), dtype=jnp.float32) * 0.1 - 2.0
    advantages = jax.random.normal(k3, (B, S), dtype=jnp.float32)
    bool_mask = jax.random.uniform(k4, (B, S)) > 0.3

    # masked path (bool mask -> int8 byte stream); ragged tail (S=8 < 128)
    out = policy_loss(log_probs, old_log_probs, advantages, bool_mask)
    jax.block_until_ready(out)
    ref = _reference_policy_loss(log_probs, old_log_probs, advantages, bool_mask)
    assert jnp.allclose(out, ref, atol=1e-5, rtol=1e-5), (out, ref)

    # masked path with a float mask (kept as float -> exact weighted mean)
    fmask = bool_mask.astype(jnp.float32)
    out = policy_loss(log_probs, old_log_probs, advantages, fmask)
    jax.block_until_ready(out)
    ref = _reference_policy_loss(log_probs, old_log_probs, advantages, fmask)
    assert jnp.allclose(out, ref, atol=1e-5, rtol=1e-5), (out, ref)

    # unmasked path
    out = policy_loss(log_probs, old_log_probs, advantages, None)
    jax.block_until_ready(out)
    ref = _reference_policy_loss(log_probs, old_log_probs, advantages, None)
    assert jnp.allclose(out, ref, atol=1e-5, rtol=1e-5), (out, ref)

    # bf16 inputs accepted directly (upcast to f32 inside the kernel)
    out = policy_loss(log_probs.astype(jnp.bfloat16),
                      old_log_probs.astype(jnp.bfloat16),
                      advantages.astype(jnp.bfloat16), bool_mask)
    jax.block_until_ready(out)
    ref = _reference_policy_loss(log_probs.astype(jnp.bfloat16),
                                 old_log_probs.astype(jnp.bfloat16),
                                 advantages.astype(jnp.bfloat16), bool_mask)
    assert jnp.allclose(out, ref, atol=1e-4, rtol=1e-4), (out, ref)

    # multi-tile grid: cross-step accumulation + in-kernel ragged tail mask
    B2, S2 = 4, 300
    j1, j2, j3, j4 = jax.random.split(jax.random.PRNGKey(0), 4)
    lp2 = jax.random.normal(j1, (B2, S2), dtype=jnp.float32) * 0.1 - 2.0
    olp2 = jax.random.normal(j2, (B2, S2), dtype=jnp.float32) * 0.1 - 2.0
    adv2 = jax.random.normal(j3, (B2, S2), dtype=jnp.float32)
    m2 = jax.random.uniform(j4, (B2, S2)) > 0.3

    out = policy_loss(lp2, olp2, adv2, m2, seq_tile=128)      # 3 seq tiles
    jax.block_until_ready(out)
    ref = _reference_policy_loss(lp2, olp2, adv2, m2)
    assert jnp.allclose(out, ref, atol=1e-5, rtol=1e-5), (out, ref)

    out = policy_loss(lp2, olp2, adv2, None, seq_tile=128)
    jax.block_until_ready(out)
    ref = _reference_policy_loss(lp2, olp2, adv2, None)
    assert jnp.allclose(out, ref, atol=1e-5, rtol=1e-5), (out, ref)

    # batch-parallel path (2 "parallel" batch shards) + ragged last tile
    B3, S3 = 16, 160
    i1, i2, i3, i4 = jax.random.split(jax.random.PRNGKey(1), 4)
    lp3 = jax.random.normal(i1, (B3, S3), dtype=jnp.float32) * 0.1 - 2.0
    olp3 = jax.random.normal(i2, (B3, S3), dtype=jnp.float32) * 0.1 - 2.0
    adv3 = jax.random.normal(i3, (B3, S3), dtype=jnp.float32)
    m3 = jax.random.uniform(i4, (B3, S3)) > 0.3

    out = policy_loss(lp3, olp3, adv3, m3, seq_tile=128)
    jax.block_until_ready(out)
    ref = _reference_policy_loss(lp3, olp3, adv3, m3)
    assert jnp.allclose(out, ref, atol=1e-5, rtol=1e-5), (out, ref)

    out = policy_loss(lp3, olp3, adv3, None, seq_tile=128)
    jax.block_until_ready(out)
    ref = _reference_policy_loss(lp3, olp3, adv3, None)
    assert jnp.allclose(out, ref, atol=1e-5, rtol=1e-5), (out, ref)

    print("KERNEL_OK")
</pallas_src>

<mosaic_0001>
module attributes {stable_mosaic.version = 11 : i64} {
  func.func @_masked_kernel(%arg0: i32, %arg1: i32, %arg2: memref<2x128xf32, #tpu.memory_space<vmem>>, %arg3: memref<2x128xf32, #tpu.memory_space<vmem>>, %arg4: memref<2x128xf32, #tpu.memory_space<vmem>>, %arg5: memref<2x128xi8, #tpu.memory_space<vmem>>, %arg6: memref<2x1xf32, #tpu.memory_space<vmem>>, %arg7: memref<2x1xf32, #tpu.memory_space<vmem>>, %arg8: memref<2x1xf32, #tpu.memory_space<vmem>>) attributes {dimension_semantics = [#tpu.dimension_semantics<parallel>, #tpu.dimension_semantics<arbitrary>], iteration_bounds = array<i64: 1, 1>, scalar_prefetch = 0 : i64, scratch_operands = 2 : i64, tpu.core_type = #tpu.core_type<tc>, window_params = [{transform_indices = @transform_0, window_bounds = array<i64: 2, 128>}, {transform_indices = @transform_1, window_bounds = array<i64: 2, 128>}, {transform_indices = @transform_2, window_bounds = array<i64: 2, 128>}, {transform_indices = @transform_3, window_bounds = array<i64: 2, 128>}, {transform_indices = @transform_4, window_bounds = array<i64: 2, 1>}]} {
    %c0_i32 = arith.constant 0 : i32
    %0 = arith.cmpi eq, %arg1, %c0_i32 : i32
    %1 = arith.extui %0 : i1 to i32
    %c0_i32_0 = arith.constant 0 : i32
    %2 = arith.cmpi ne, %1, %c0_i32_0 : i32
    scf.if %2 {
      %cst_25 = arith.constant 0.000000e+00 : f32
      %45 = vector.broadcast %cst_25 : f32 to vector<2x1xf32>
      %c0_26 = arith.constant 0 : index
      %c0_27 = arith.constant 0 : index
      %46 = vector.load %arg7[%c0_26, %c0_27] : memref<2x1xf32, #tpu.memory_space<vmem>>, vector<2x1xf32>
      tpu.vector_store %arg7[%c0_26, %c0_27], %45 {strides = array<i32>} : memref<2x1xf32, #tpu.memory_space<vmem>>, vector<2x1xf32>,
      %cst_28 = arith.constant 0.000000e+00 : f32
      %47 = vector.broadcast %cst_28 : f32 to vector<2x1xf32>
      %c0_29 = arith.constant 0 : index
      %c0_30 = arith.constant 0 : index
      %48 = vector.load %arg8[%c0_29, %c0_30] : memref<2x1xf32, #tpu.memory_space<vmem>>, vector<2x1xf32>
      tpu.vector_store %arg8[%c0_29, %c0_30], %47 {strides = array<i32>} : memref<2x1xf32, #tpu.memory_space<vmem>>, vector<2x1xf32>,
    } else {
    }
    %c0 = arith.constant 0 : index
    %c0_1 = arith.constant 0 : index
    %3 = vector.load %arg2[%c0, %c0_1] : memref<2x128xf32, #tpu.memory_space<vmem>>, vector<2x128xf32>
    %c0_2 = arith.constant 0 : index
    %c0_3 = arith.constant 0 : index
    %4 = vector.load %arg3[%c0_2, %c0_3] : memref<2x128xf32, #tpu.memory_space<vmem>>, vector<2x128xf32>
    %5 = arith.subf %3, %4 : vector<2x128xf32>
    %c0_4 = arith.constant 0 : index
    %c0_5 = arith.constant 0 : index
    %6 = vector.load %arg4[%c0_4, %c0_5] : memref<2x128xf32, #tpu.memory_space<vmem>>, vector<2x128xf32>
    %c0_6 = arith.constant 0 : index
    %c0_7 = arith.constant 0 : index
    %7 = vector.load %arg5[%c0_6, %c0_7] : memref<2x128xi8, #tpu.memory_space<vmem>>, vector<2x128xi8>
    %8 = arith.sitofp %7 : vector<2x128xi8> to vector<2x128xf32>
    %9 = tpu.iota {dimensions = array<i32: 1>} : vector<2x128xi32>
    %c128_i32 = arith.constant 128 : i32
    %10 = arith.muli %arg1, %c128_i32 : i32
    %11 = vector.broadcast %10 : i32 to vector<2x128xi32>
    %12 = arith.addi %9, %11 : vector<2x128xi32>
    %c8_i32 = arith.constant 8 : i32
    %13 = vector.broadcast %c8_i32 : i32 to vector<2x128xi32>
    %14 = arith.cmpi slt, %12, %13 : vector<2x128xi32>
    %cst = arith.constant 0.000000e+00 : f32
    %15 = vector.broadcast %cst : f32 to vector<2x128xf32>
    %16 = arith.select %14, %5, %15 : vector<2x128xi1>, vector<2x128xf32>
    %cst_8 = arith.constant 0.000000e+00 : f32
    %17 = vector.broadcast %cst_8 : f32 to vector<2x128xf32>
    %18 = arith.select %14, %6, %17 : vector<2x128xi1>, vector<2x128xf32>
    %cst_9 = arith.constant 0.000000e+00 : f32
    %19 = vector.broadcast %cst_9 : f32 to vector<2x128xf32>
    %20 = arith.select %14, %8, %19 : vector<2x128xi1>, vector<2x128xf32>
    %21 = math.exp %16 : vector<2x128xf32>
    %22 = arith.mulf %21, %18 : vector<2x128xf32>
    %cst_10 = arith.constant 8.000000e-01 : f32
    %cst_11 = arith.constant 1.200000e+00 : f32
    %23 = vector.broadcast %cst_10 : f32 to vector<2x128xf32>
    %24 = arith.maximumf %23, %21 : vector<2x128xf32>
    %25 = vector.broadcast %cst_11 : f32 to vector<2x128xf32>
    %26 = arith.minimumf %25, %24 : vector<2x128xf32>
    %27 = arith.mulf %26, %18 : vector<2x128xf32>
    %28 = arith.minimumf %22, %27 : vector<2x128xf32>
    %cst_12 = arith.constant 0.000000e+00 : f32
    %29 = vector.broadcast %cst_12 : f32 to vector<2x128xf32>
    %30 = arith.subf %29, %28 : vector<2x128xf32>
    %c0_13 = arith.constant 0 : index
    %c0_14 = arith.constant 0 : index
    %31 = vector.load %arg7[%c0_13, %c0_14] : memref<2x1xf32, #tpu.memory_space<vmem>>, vector<2x1xf32>
    %32 = arith.mulf %30, %20 : vector<2x128xf32>
    %cst_15 = arith.constant dense<0.000000e+00> : vector<2xf32>
    %33 = vector.multi_reduction <add>, %32, %cst_15 [1] : vector<2x128xf32> to vector<2xf32>
    %34 = vector.shape_cast %33 : vector<2xf32> to vector<2x1xf32>
    %35 = arith.addf %31, %34 : vector<2x1xf32>
    %c0_16 = arith.constant 0 : index
    %c0_17 = arith.constant 0 : index
    %36 = vector.load %arg7[%c0_16, %c0_17] : memref<2x1xf32, #tpu.memory_space<vmem>>, vector<2x1xf32>
    tpu.vector_store %arg7[%c0_16, %c0_17], %35 {strides = array<i32>} : memref<2x1xf32, #tpu.memory_space<vmem>>, vector<2x1xf32>,
    %c0_18 = arith.constant 0 : index
    %c0_19 = arith.constant 0 : index
    %37 = vector.load %arg8[%c0_18, %c0_19] : memref<2x1xf32, #tpu.memory_space<vmem>>, vector<2x1xf32>
    %cst_20 = arith.constant dense<0.000000e+00> : vector<2xf32>
    %38 = vector.multi_reduction <add>, %20, %cst_20 [1] : vector<2x128xf32> to vector<2xf32>
    %39 = vector.shape_cast %38 : vector<2xf32> to vector<2x1xf32>
    %40 = arith.addf %37, %39 : vector<2x1xf32>
    %c0_21 = arith.constant 0 : index
    %c0_22 = arith.constant 0 : index
    %41 = vector.load %arg8[%c0_21, %c0_22] : memref<2x1xf32, #tpu.memory_space<vmem>>, vector<2x1xf32>
    tpu.vector_store %arg8[%c0_21, %c0_22], %40 {strides = array<i32>} : memref<2x1xf32, #tpu.memory_space<vmem>>, vector<2x1xf32>,
    %c0_i32_23 = arith.constant 0 : i32
    %42 = arith.cmpi eq, %arg1, %c0_i32_23 : i32
    %43 = arith.extui %42 : i1 to i32
    %c0_i32_24 = arith.constant 0 : i32
    %44 = arith.cmpi ne, %43, %c0_i32_24 : i32
    scf.if %44 {
      %c0_25 = arith.constant 0 : index
      %c0_26 = arith.constant 0 : index
      %45 = vector.load %arg7[%c0_25, %c0_26] : memref<2x1xf32, #tpu.memory_space<vmem>>, vector<2x1xf32>
      %c0_27 = arith.constant 0 : index
      %c0_28 = arith.constant 0 : index
      %46 = vector.load %arg8[%c0_27, %c0_28] : memref<2x1xf32, #tpu.memory_space<vmem>>, vector<2x1xf32>
      %cst_29 = arith.constant 9.99999993E-9 : f32
      %47 = vector.broadcast %cst_29 : f32 to vector<2x1xf32>
      %48 = arith.addf %46, %47 : vector<2x1xf32>
      %49 = arith.divf %45, %48 : vector<2x1xf32>
      %c0_30 = arith.constant 0 : index
      %c0_31 = arith.constant 0 : index
      %50 = vector.load %arg6[%c0_30, %c0_31] : memref<2x1xf32, #tpu.memory_space<vmem>>, vector<2x1xf32>
      tpu.vector_store %arg6[%c0_30, %c0_31], %49 {strides = array<i32>} : memref<2x1xf32, #tpu.memory_space<vmem>>, vector<2x1xf32>,
    } else {
    }
    return
  }
  func.func @transform_0(%arg0: i32, %arg1: i32) -> (i32, i32) {
    %c0_i32 = arith.constant 0 : i32
    return %arg0, %arg1 : i32, i32
  }
  func.func @transform_1(%arg0: i32, %arg1: i32) -> (i32, i32) {
    %c0_i32 = arith.constant 0 : i32
    return %arg0, %arg1 : i32, i32
  }
  func.func @transform_2(%arg0: i32, %arg1: i32) -> (i32, i32) {
    %c0_i32 = arith.constant 0 : i32
    return %arg0, %arg1 : i32, i32
  }
  func.func @transform_3(%arg0: i32, %arg1: i32) -> (i32, i32) {
    %c0_i32 = arith.constant 0 : i32
    return %arg0, %arg1 : i32, i32
  }
  func.func @transform_4(%arg0: i32, %arg1: i32) -> (i32, i32) {
    %c0_i32 = arith.constant 0 : i32
    %c0_i32_0 = arith.constant 0 : i32
    return %arg0, %c0_i32 : i32, i32
  }
}

</mosaic_0001>

<bundles_post_ra>
// kernel: tpu_custom_call.1
= control target key start
LH: loop header
LB: loop body
LE: loop exit
PB: predicated region body
PF: predicated region fallthrough
CT: control target
= control target key end

     0   :  { %9 = vsyncpa [#allocation5], 0  ;;  %s206_s0 = inlined_call_operand.hbm [shape: f32[2,8], index: 0, kind: input, shape index: {}]   ;;  %s207_s1 = inlined_call_operand.hbm [shape: f32[2,8], index: 1, kind: input, shape index: {}]   ;;  %s208_s2 = inlined_call_operand.vmem [shape: f32[2,8], index: 2, kind: input, shape index: {}]   ;;  %s209_s3 = inlined_call_operand.vmem [shape: s8[2,8], index: 3, kind: input, shape index: {}]   ;;  %s210_s4 = inlined_call_operand.vmem [shape: f32[2,1], index: 4, kind: output, shape index: {}]  }
   0x1   :  { %10 = vsyncpa [#allocation7], 0  ;;  %s153_s15 = smov [#allocation4]   ;;  %s154_s17 = smov [#allocation6]  }
   0x2   :  { %s17_s16 = sshll.u32 %s153_s15, 4  ;;  %s27_s18 = sshll.u32 %s154_s17, 4  ;;  %s18_s16 = int_to_ptr.vmem [resolvable:$true] %s17_s16  ;;  %s28_s18 = int_to_ptr.vmem [resolvable:$true] %s27_s18 }
   0x3   :  { %s117_s19 = scalar_lea.vmem %s18_s16, 32  ;;  %p122_p1 = scmp.lt.s32.totalorder %s18_s16, %s18_s16 }
   0x4   :  { %p118_p0 = scmp.ne.s32.totalorder %s18_s16, %s117_s19  ;;  %p123_p2 = scmp.lt.s32.totalorder %s117_s19, %s117_s19 }
   0x6   :  { %p124_p3 = por %p123_p2, %p122_p1 }
   0x8   :  { %p125_p4 = pnand %p124_p3, %p118_p0 }
   0xa   :  { %128 = shalt.err (!%p125_p4)
}
   0xb   :  { %20 = dma.hbm_to_vmem [thread:$0]  %s206_s0, 32, %s18_s16, [#allocation5]  }
   0xc   :  { %s137_s22 = scalar_lea.vmem %s28_s18, 32  ;;  %p142_p6 = scmp.lt.s32.totalorder %s28_s18, %s28_s18 }
   0xd   :  { %p138_p5 = scmp.ne.s32.totalorder %s28_s18, %s137_s22  ;;  %p143_p7 = scmp.lt.s32.totalorder %s137_s22, %s137_s22 }
   0xf   :  { %p144_p8 = por %p143_p7, %p142_p6 }
  0x11   :  { %p145_p9 = pnand %p144_p8, %p138_p5 }
  0x13   :  { %148 = shalt.err (!%p145_p9)
}
  0x14   :  { %30 = dma.hbm_to_vmem [thread:$0]  %s207_s1, 32, %s28_s18, [#allocation7]  }
  0x15   :  { %149 = dma.done.wait [#allocation5], 32  }
  0x16   :  { %150 = vsyncadd [#allocation5], 4294967264 }
  0x17   :  { %151 = dma.done.wait [#allocation7], 32  }
  0x18   :  { %152 = vsyncadd [#allocation7], 4294967264  ;;  %v55_v0 = vlaneseq  ;;  %vm45_vm0 = vcmask 1024   ;;  %v155_v1 = vmov 0.0   ;;  %v52_v3 = vld [vmem:[%s209_s3] sm:$0x1] }
  0x19   :  { %47 = vst.msk [vmem:[#allocation3] sm:$0x3] %vm45_vm0, %v155_v1  ;;  %46 = vst.msk [vmem:[#allocation2] sm:$0x3] %vm45_vm0, %v155_v1  ;;  %v48_v4 = vld [vmem:[#allocation4] sm:$0x3]  ;;  %v53_v6 = vunpack.c.0.s8 %v52_v3 }
  0x1a   :  { %v56_v2 = vand.u32 127, %v55_v0  ;;  %v49_v5 = vld [vmem:[#allocation6] sm:$0x3]  ;;  %vm74_vm2 = vcmask 1041408   ;;  %v51_v13 = vld [vmem:[%s208_s2] sm:$0x3] }
  0x1b   :  { %v50_v7 = vsub.f32 %v48_v4, %v49_v5  ;;  %v54_v8 = vcvt.s32.f32 %v53_v6 }
  0x1c   :  { %vm60_vm1 = vcmp.lt.s32.totalorder %v56_v2, 8 }
  0x1d   :  { %v61_v9 = vsel %vm60_vm1, %v50_v7, 0.0  ;;  %v63_v11 = vsel %vm60_vm1, %v54_v8, 0.0  ;;  %v62_v15 = vsel %vm60_vm1, %v51_v13, 0.0 }
  0x1e   :  { %v64_v10 = vmul.f32 1.442695, %v61_v9  ;;  %v82_v12 = vsel %vm74_vm2, %v63_v11, 0.0 }
  0x1f   :  { %83 = vadd.xlane.f32.xlu0 %v82_v12 }
  0x20   :  { %105 = vpow2.f32 %v64_v10  ;;  %v81_v24 = vld [vmem:[#allocation3] sm:$0x3]  ;;  %v72_v29 = vld [vmem:[#allocation2] sm:$0x3] }
  0x2d   :  { %v106_v14 = vpop.eup %105 }
  0x2e   :  { %v67_v16 = vmax.f32 %v106_v14, 0.8  ;;  %v66_v17 = vmul.f32 %v106_v14, %v62_v15 }
  0x30   :  { %v68_v18 = vmin.f32 %v67_v16, 1.2 }
  0x32   :  { %v69_v19 = vmul.f32 %v68_v18, %v62_v15 }
  0x34   :  { %v70_v20 = vmin.f32 %v66_v17, %v69_v19 }
  0x36   :  { %v71_v21 = vsub.f32 0.0, %v70_v20 }
  0x38   :  { %v73_v22 = vmul.f32 %v71_v21, %v63_v11 }
  0x3a   :  { %v75_v23 = vsel %vm74_vm2, %v73_v22, 0.0 }
  0x3b   :  { %76 = vadd.xlane.f32.xlu0 %v75_v23 }
  0xa8   :  { %v84_v25 = vpop.xlane.xlu0 %83 }
  0xa9   :  { %v85_v26 = vadd.f32 %v84_v25, %v81_v24 }
  0xab   :  { %86 = vst.msk [vmem:[#allocation3] sm:$0x3] %vm45_vm0, %v85_v26 }
  0xb2   :  { %v91_v27 = vld [vmem:[#allocation3] sm:$0x3] }
  0xb3   :  { %v92_v28 = vadd.f32 1e-08, %v91_v27 }
  0xb5   :  { %107 = vrcp.f32 %v92_v28 }
  0xc2   :  { %v108_v32 = vpop.eup %107 }
  0xc4   :  { %v77_v30 = vpop.xlane.xlu0 %76 }
  0xc5   :  { %v78_v31 = vadd.f32 %v77_v30, %v72_v29 }
  0xc7   :  { %80 = vst.msk [vmem:[#allocation2] sm:$0x3] %vm45_vm0, %v78_v31 }
  0xce   :  { %v90_v33 = vld [vmem:[#allocation2] sm:$0x3] }
  0xcf   :  { %v94_v34 = vmul.f32 %v108_v32, %v90_v33 }
  0xd1   :  { %95 = vst.msk [vmem:[%s210_s4] sm:$0x3] %vm45_vm0, %v94_v34 }
  0xd2   :  { %100 = vsyncpa [#allocation5], 1 }
  0xd3   :  { %101 = vsyncpa [#allocation7], 1 }

</bundles_post_ra>
